<compile_context>
chip_gen: v5e
topology: v5e:2x2
jax: 0.10.0
libtpu: 0.0.40
codegen_flags: <defaults>
</compile_context>

<pallas_src>
import jax
import jax.numpy as jnp
from jax.experimental import pallas as pl
from jax.experimental.pallas import tpu as pltpu

N_BINS = 15
_LANES = 128


def _round_up(x, m):
    return (x + m - 1) // m * m


def _vmem_capacity_bytes():
    try:
        return int(pltpu.get_tpu_info().vmem_capacity_bytes)
    except Exception:
        return 64 * 1024 * 1024  # conservative (v7x-sized) fallback


def _ece_kernel(n_ref, logits_ref, labels_ref, out_ref):
    s = pl.program_id(0)          # split (parallel axis -> one per TensorCore)
    i = pl.program_id(1)          # tile within split (reduction axis)
    tiles_per_split = pl.num_programs(1)
    tile_n, c = logits_ref.shape

    @pl.when(i == 0)
    def _init():
        out_ref[0] = jnp.zeros((8, _LANES), jnp.float32)

    x = logits_ref[...].astype(jnp.float32)                       # (T, C)
    labels = labels_ref[...]                                      # (T, 1) int32

    # conf = max softmax prob = 1 / sum(exp(x - max)); no full softmax needed.
    m = jnp.max(x, axis=1, keepdims=True)                         # (T, 1)
    ssum = jnp.sum(jnp.exp(x - m), axis=1, keepdims=True)         # (T, 1)
    conf = pl.reciprocal(ssum, approx=False)                      # (T, 1)

    # argmax of logits (first max index) == argmax of softmax.
    col = jax.lax.broadcasted_iota(jnp.int32, (tile_n, c), 1)
    pred = jnp.min(jnp.where(x == m, col, c), axis=1, keepdims=True)
    correct = (pred == labels).astype(jnp.float32)                # (T, 1)

    # Rows beyond the true N (padding) get routed to lane 127, which the
    # finalize step never reads -> no per-row validity multiply needed.
    row = jax.lax.broadcasted_iota(jnp.int32, (tile_n, 1), 0)
    grow = row + (s * tiles_per_split + i) * tile_n
    valid = grow < n_ref[0]                                       # (T, 1) bool

    # Bin index with (lower, upper] semantics; conf == 1.0 -> last bin.
    b = jnp.ceil(conf * jnp.float32(N_BINS)).astype(jnp.int32) - 1
    b = jnp.clip(b, 0, N_BINS - 1)
    b = jnp.where(valid, b, _LANES - 1)                           # (T, 1)

    # One compare builds the bin one-hot; conf / correct payloads reuse it.
    lane = jax.lax.broadcasted_iota(jnp.int32, (tile_n, _LANES), 1)
    hit = lane == b                                               # (T, 128) bool
    onehot = hit.astype(jnp.float32)
    p_conf = jnp.where(hit, conf, 0.0)
    p_corr = jnp.where(hit, correct, 0.0)

    # Constant single-row selectors: column-sum each payload on the MXU,
    # depositing count / sum_conf / sum_correct into rows 0 / 1 / 2.
    ridx = jax.lax.broadcasted_iota(jnp.int32, (8, tile_n), 0)
    sel0 = (ridx == 0).astype(jnp.float32)
    sel1 = (ridx == 1).astype(jnp.float32)
    sel2 = (ridx == 2).astype(jnp.float32)

    upd = (jnp.dot(sel0, onehot, preferred_element_type=jnp.float32)
           + jnp.dot(sel1, p_conf, preferred_element_type=jnp.float32)
           + jnp.dot(sel2, p_corr, preferred_element_type=jnp.float32))
    out_ref[0] += upd


def ece_loss(logits, labels, *, tile_n=None, num_splits=2):
    """logits: (N, C) float/bf16, labels: (N,) int -> ece: (1,) float32."""
    n, c = logits.shape
    itemsize = jnp.dtype(logits.dtype).itemsize

    # Generation-aware VMEM budget (v5e/v6e: 128 MiB, v7x: 64 MiB per TC).
    big_vmem = _vmem_capacity_bytes() >= 100 * 1024 * 1024
    io_budget = (8 if big_vmem else 3) * 1024 * 1024      # per logits tile (x2 dbuf)
    interm_budget = (16 if big_vmem else 8) * 1024 * 1024  # live (T,128) f32 temps
    vmem_limit = (72 if big_vmem else 40) * 1024 * 1024

    if tile_n is None:
        rows_io = io_budget // max(1, c * itemsize)
        rows_interm = interm_budget // (_LANES * 4 * 4)     # ~4 live (T,128) f32
        tile_n = max(8, min(rows_io, rows_interm))
    tile_n = int(min(tile_n, _round_up(n, 8)))
    tile_n = _round_up(tile_n, 8)

    total_tiles = -(-n // tile_n)
    num_splits = int(max(1, min(num_splits, total_tiles)))
    tiles_per_split = -(-total_tiles // num_splits)
    n_pad = num_splits * tiles_per_split * tile_n

    if n_pad != n:
        logits = jnp.pad(logits, ((0, n_pad - n), (0, 0)))
        labels = jnp.pad(labels, ((0, n_pad - n),))
    labels2d = labels.reshape(n_pad, 1).astype(jnp.int32)
    n_true = jnp.array([n], dtype=jnp.int32)                # scalar prefetch (SMEM)

    row_map = lambda s, i, n_ref, T=tiles_per_split: (s * T + i, 0)
    partials = pl.pallas_call(
        _ece_kernel,
        out_shape=jax.ShapeDtypeStruct((num_splits, 8, _LANES), jnp.float32),
        grid_spec=pltpu.PrefetchScalarGridSpec(
            num_scalar_prefetch=1,
            grid=(num_splits, tiles_per_split),
            in_specs=[
                pl.BlockSpec((tile_n, c), row_map),
                pl.BlockSpec((tile_n, 1), row_map),
            ],
            out_specs=pl.BlockSpec((1, 8, _LANES), lambda s, i, n_ref: (s, 0, 0)),
        ),
        compiler_params=pltpu.CompilerParams(
            dimension_semantics=("parallel", "arbitrary"),
            vmem_limit_bytes=vmem_limit,
        ),
    )(n_true, logits, labels2d)

    # Tiny per-bin combine (15 scalars) in plain JAX, per perf review.
    acc = jnp.sum(partials, axis=0)                         # (8, 128)
    count = acc[0, :N_BINS]
    sum_conf = acc[1, :N_BINS]
    sum_corr = acc[2, :N_BINS]
    prop = count / jnp.float32(n)
    safe = jnp.maximum(count, 1.0)
    gap = jnp.abs(sum_conf / safe - sum_corr / safe)
    ece = jnp.sum(jnp.where(count > 0.0, gap * prop, 0.0))
    return ece.reshape(1).astype(jnp.float32)


def _ece_reference(logits, labels):
    """Pure-JAX reference mirroring the PyTorch forward."""
    p = jax.nn.softmax(logits.astype(jnp.float32), axis=1)
    conf = jnp.max(p, axis=1)
    pred = jnp.argmax(p, axis=1)
    acc = (pred == labels).astype(jnp.float32)
    n = logits.shape[0]
    bounds = jnp.linspace(0.0, 1.0, N_BINS + 1)
    ece = jnp.zeros((1,), jnp.float32)
    for i in range(N_BINS):
        in_bin = jnp.logical_and(conf > bounds[i], conf <= bounds[i + 1])
        cnt = jnp.sum(in_bin.astype(jnp.float32))
        prop = cnt / n
        safe = jnp.maximum(cnt, 1.0)
        acc_b = jnp.sum(acc * in_bin) / safe
        conf_b = jnp.sum(conf * in_bin) / safe
        ece = ece + jnp.where(cnt > 0, jnp.abs(conf_b - acc_b) * prop, 0.0)
    return ece


if __name__ == "__main__":
    key = jax.random.PRNGKey(0)
    k1, k2 = jax.random.split(key)
    N, C = 200, 16
    logits = jax.random.normal(k1, (N, C), dtype=jnp.float32) * 3.0
    labels = jax.random.randint(k2, (N,), 0, C, dtype=jnp.int32)

    ref = jax.block_until_ready(_ece_reference(logits, labels))

    # Small explicit tile (64 rows) -> grid (2, 2): exercises the dual-split
    # axis, the carried accumulator and the padded-row masking.
    ece = jax.block_until_ready(ece_loss(logits, labels, tile_n=64))
    assert ece.shape == (1,)
    assert jnp.allclose(ece, ref, atol=1e-5), (ece, ref)

    # Auto byte-budgeted tile (single tile here) -> also must match.
    ece2 = jax.block_until_ready(ece_loss(logits, labels))
    assert jnp.allclose(ece2, ref, atol=1e-5), (ece2, ref)

    print("KERNEL_OK")
</pallas_src>

<mosaic_0001>
module attributes {stable_mosaic.version = 11 : i64} {
  func.func @_ece_kernel(%arg0: i32, %arg1: i32, %arg2: memref<1xi32, #tpu.memory_space<smem>>, %arg3: memref<64x16xf32, #tpu.memory_space<vmem>>, %arg4: memref<64x1xi32, #tpu.memory_space<vmem>>, %arg5: memref<1x8x128xf32, #tpu.memory_space<vmem>>) attributes {dimension_semantics = [#tpu.dimension_semantics<parallel>, #tpu.dimension_semantics<arbitrary>], iteration_bounds = array<i64: 2, 2>, scalar_prefetch = 1 : i64, scratch_operands = 0 : i64, tpu.core_type = #tpu.core_type<tc>, window_params = [{transform_indices = @transform_0, window_bounds = array<i64: 64, 16>}, {transform_indices = @transform_1, window_bounds = array<i64: 64, 1>}, {transform_indices = @transform_2, window_bounds = array<i64: 1, 8, 128>}]} {
    %c0_i32 = arith.constant 0 : i32
    %0 = arith.cmpi eq, %arg1, %c0_i32 : i32
    %1 = arith.extui %0 : i1 to i32
    %c0_i32_0 = arith.constant 0 : i32
    %2 = arith.cmpi ne, %1, %c0_i32_0 : i32
    scf.if %2 {
      %cst_23 = arith.constant 0.000000e+00 : f32
      %81 = vector.broadcast %cst_23 : f32 to vector<8x128xf32>
      %c0_24 = arith.constant 0 : index
      %c0_25 = arith.constant 0 : index
      %c0_26 = arith.constant 0 : index
      %82 = vector.load %arg5[%c0_24, %c0_25, %c0_26] : memref<1x8x128xf32, #tpu.memory_space<vmem>>, vector<1x8x128xf32>
      %83 = vector.shape_cast %82 : vector<1x8x128xf32> to vector<8x128xf32>
      %84 = vector.shape_cast %81 : vector<8x128xf32> to vector<1x8x128xf32>
      tpu.vector_store %arg5[%c0_24, %c0_25, %c0_26], %84 {strides = array<i32>} : memref<1x8x128xf32, #tpu.memory_space<vmem>>, vector<1x8x128xf32>,
    } else {
    }
    %c0 = arith.constant 0 : index
    %c0_1 = arith.constant 0 : index
    %3 = vector.load %arg3[%c0, %c0_1] : memref<64x16xf32, #tpu.memory_space<vmem>>, vector<64x16xf32>
    %c0_2 = arith.constant 0 : index
    %c0_3 = arith.constant 0 : index
    %4 = vector.load %arg4[%c0_2, %c0_3] : memref<64x1xi32, #tpu.memory_space<vmem>>, vector<64x1xi32>
    %cst = arith.constant dense<0xFF800000> : vector<64xf32>
    %5 = vector.multi_reduction <maximumf>, %3, %cst [1] : vector<64x16xf32> to vector<64xf32>
    %6 = vector.shape_cast %5 : vector<64xf32> to vector<64x1xf32>
    %7 = vector.broadcast %6 : vector<64x1xf32> to vector<64x16xf32>
    %8 = arith.subf %3, %7 : vector<64x16xf32>
    %9 = math.exp %8 : vector<64x16xf32>
    %cst_4 = arith.constant dense<0.000000e+00> : vector<64xf32>
    %10 = vector.multi_reduction <add>, %9, %cst_4 [1] : vector<64x16xf32> to vector<64xf32>
    %11 = vector.shape_cast %10 : vector<64xf32> to vector<64x1xf32>
    %12 = tpu.reciprocal %11 : vector<64x1xf32> -> vector<64x1xf32>
    %13 = tpu.iota {dimensions = array<i32: 1>} : vector<64x16xi32>
    %14 = vector.broadcast %6 : vector<64x1xf32> to vector<64x16xf32>
    %15 = arith.cmpf oeq, %3, %14 : vector<64x16xf32>
    %c16_i32 = arith.constant 16 : i32
    %16 = vector.broadcast %c16_i32 : i32 to vector<64x16xi32>
    %17 = arith.select %15, %13, %16 : vector<64x16xi1>, vector<64x16xi32>
    %cst_5 = arith.constant dense<2147483647> : vector<64xi32>
    %18 = vector.multi_reduction <minsi>, %17, %cst_5 [1] : vector<64x16xi32> to vector<64xi32>
    %19 = vector.shape_cast %18 : vector<64xi32> to vector<64x1xi32>
    %20 = arith.cmpi eq, %19, %4 : vector<64x1xi32>
    %21 = arith.extui %20 : vector<64x1xi1> to vector<64x1xi32>
    %22 = arith.sitofp %21 : vector<64x1xi32> to vector<64x1xf32>
    %23 = tpu.iota {dimensions = array<i32: 0>} : vector<64x1xi32>
    %c2_i32 = arith.constant 2 : i32
    %24 = arith.muli %arg0, %c2_i32 : i32
    %25 = arith.addi %24, %arg1 : i32
    %c64_i32 = arith.constant 64 : i32
    %26 = arith.muli %25, %c64_i32 : i32
    %27 = vector.broadcast %26 : i32 to vector<64x1xi32>
    %28 = arith.addi %23, %27 : vector<64x1xi32>
    %c0_6 = arith.constant 0 : index
    %29 = memref.load %arg2[%c0_6] : memref<1xi32, #tpu.memory_space<smem>>
    %30 = vector.broadcast %29 : i32 to vector<64x1xi32>
    %31 = arith.cmpi slt, %28, %30 : vector<64x1xi32>
    %cst_7 = arith.constant 1.500000e+01 : f32
    %32 = vector.broadcast %cst_7 : f32 to vector<64x1xf32>
    %33 = arith.mulf %12, %32 : vector<64x1xf32>
    %34 = math.ceil %33 : vector<64x1xf32>
    %35 = arith.fptosi %34 : vector<64x1xf32> to vector<64x1xi32>
    %c1_i32 = arith.constant 1 : i32
    %36 = vector.broadcast %c1_i32 : i32 to vector<64x1xi32>
    %37 = arith.subi %35, %36 : vector<64x1xi32>
    %c0_i32_8 = arith.constant 0 : i32
    %c14_i32 = arith.constant 14 : i32
    %38 = vector.broadcast %c0_i32_8 : i32 to vector<64x1xi32>
    %39 = arith.maxsi %38, %37 : vector<64x1xi32>
    %40 = vector.broadcast %c14_i32 : i32 to vector<64x1xi32>
    %41 = arith.minsi %40, %39 : vector<64x1xi32>
    %c127_i32 = arith.constant 127 : i32
    %42 = vector.broadcast %c127_i32 : i32 to vector<64x1xi32>
    %43 = arith.select %31, %41, %42 : vector<64x1xi1>, vector<64x1xi32>
    %44 = tpu.iota {dimensions = array<i32: 1>} : vector<64x128xi32>
    %45 = vector.broadcast %43 : vector<64x1xi32> to vector<64x128xi32>
    %46 = arith.cmpi eq, %44, %45 : vector<64x128xi32>
    %47 = arith.extui %46 : vector<64x128xi1> to vector<64x128xi32>
    %48 = arith.sitofp %47 : vector<64x128xi32> to vector<64x128xf32>
    %cst_9 = arith.constant 0.000000e+00 : f32
    %49 = vector.shape_cast %12 : vector<64x1xf32> to vector<64x1xf32>
    %50 = vector.broadcast %49 : vector<64x1xf32> to vector<64x128xf32>
    %51 = vector.broadcast %cst_9 : f32 to vector<64x128xf32>
    %52 = arith.select %46, %50, %51 : vector<64x128xi1>, vector<64x128xf32>
    %cst_10 = arith.constant 0.000000e+00 : f32
    %53 = vector.shape_cast %22 : vector<64x1xf32> to vector<64x1xf32>
    %54 = vector.broadcast %53 : vector<64x1xf32> to vector<64x128xf32>
    %55 = vector.broadcast %cst_10 : f32 to vector<64x128xf32>
    %56 = arith.select %46, %54, %55 : vector<64x128xi1>, vector<64x128xf32>
    %57 = tpu.iota {dimensions = array<i32: 0>} : vector<8x64xi32>
    %c0_i32_11 = arith.constant 0 : i32
    %58 = vector.broadcast %c0_i32_11 : i32 to vector<8x64xi32>
    %59 = arith.cmpi eq, %57, %58 : vector<8x64xi32>
    %60 = arith.extui %59 : vector<8x64xi1> to vector<8x64xi32>
    %61 = arith.sitofp %60 : vector<8x64xi32> to vector<8x64xf32>
    %c1_i32_12 = arith.constant 1 : i32
    %62 = vector.broadcast %c1_i32_12 : i32 to vector<8x64xi32>
    %63 = arith.cmpi eq, %57, %62 : vector<8x64xi32>
    %64 = arith.extui %63 : vector<8x64xi1> to vector<8x64xi32>
    %65 = arith.sitofp %64 : vector<8x64xi32> to vector<8x64xf32>
    %c2_i32_13 = arith.constant 2 : i32
    %66 = vector.broadcast %c2_i32_13 : i32 to vector<8x64xi32>
    %67 = arith.cmpi eq, %57, %66 : vector<8x64xi32>
    %68 = arith.extui %67 : vector<8x64xi1> to vector<8x64xi32>
    %69 = arith.sitofp %68 : vector<8x64xi32> to vector<8x64xf32>
    %cst_14 = arith.constant dense<0.000000e+00> : vector<8x128xf32>
    %70 = tpu.matmul %61, %48, %cst_14 {dimension_numbers = #tpu.dot_dimension_numbers<[1], [0], [0], [1], [0, 0, 1, 1], [], []>} : vector<8x64xf32>, vector<64x128xf32>, vector<8x128xf32> -> vector<8x128xf32>
    %cst_15 = arith.constant dense<0.000000e+00> : vector<8x128xf32>
    %71 = tpu.matmul %65, %52, %cst_15 {dimension_numbers = #tpu.dot_dimension_numbers<[1], [0], [0], [1], [0, 0, 1, 1], [], []>} : vector<8x64xf32>, vector<64x128xf32>, vector<8x128xf32> -> vector<8x128xf32>
    %72 = arith.addf %70, %71 : vector<8x128xf32>
    %cst_16 = arith.constant dense<0.000000e+00> : vector<8x128xf32>
    %73 = tpu.matmul %69, %56, %cst_16 {dimension_numbers = #tpu.dot_dimension_numbers<[1], [0], [0], [1], [0, 0, 1, 1], [], []>} : vector<8x64xf32>, vector<64x128xf32>, vector<8x128xf32> -> vector<8x128xf32>
    %74 = arith.addf %72, %73 : vector<8x128xf32>
    %c0_17 = arith.constant 0 : index
    %c0_18 = arith.constant 0 : index
    %c0_19 = arith.constant 0 : index
    %75 = vector.load %arg5[%c0_17, %c0_18, %c0_19] : memref<1x8x128xf32, #tpu.memory_space<vmem>>, vector<1x8x128xf32>
    %76 = vector.shape_cast %75 : vector<1x8x128xf32> to vector<8x128xf32>
    %77 = arith.addf %76, %74 : vector<8x128xf32>
    %c0_20 = arith.constant 0 : index
    %c0_21 = arith.constant 0 : index
    %c0_22 = arith.constant 0 : index
    %78 = vector.load %arg5[%c0_20, %c0_21, %c0_22] : memref<1x8x128xf32, #tpu.memory_space<vmem>>, vector<1x8x128xf32>
    %79 = vector.shape_cast %78 : vector<1x8x128xf32> to vector<8x128xf32>
    %80 = vector.shape_cast %77 : vector<8x128xf32> to vector<1x8x128xf32>
    tpu.vector_store %arg5[%c0_20, %c0_21, %c0_22], %80 {strides = array<i32>} : memref<1x8x128xf32, #tpu.memory_space<vmem>>, vector<1x8x128xf32>,
    return
  }
  func.func @transform_0(%arg0: i32, %arg1: i32, %arg2: memref<1xi32, #tpu.memory_space<smem>>) -> (i32, i32) {
    %c2_i32 = arith.constant 2 : i32
    %0 = arith.muli %arg0, %c2_i32 : i32
    %1 = arith.addi %0, %arg1 : i32
    %c0_i32 = arith.constant 0 : i32
    %c0_i32_0 = arith.constant 0 : i32
    return %1, %c0_i32 : i32, i32
  }
  func.func @transform_1(%arg0: i32, %arg1: i32, %arg2: memref<1xi32, #tpu.memory_space<smem>>) -> (i32, i32) {
    %c2_i32 = arith.constant 2 : i32
    %0 = arith.muli %arg0, %c2_i32 : i32
    %1 = arith.addi %0, %arg1 : i32
    %c0_i32 = arith.constant 0 : i32
    %c0_i32_0 = arith.constant 0 : i32
    return %1, %c0_i32 : i32, i32
  }
  func.func @transform_2(%arg0: i32, %arg1: i32, %arg2: memref<1xi32, #tpu.memory_space<smem>>) -> (i32, i32, i32) {
    %c0_i32 = arith.constant 0 : i32
    %c0_i32_0 = arith.constant 0 : i32
    %c0_i32_1 = arith.constant 0 : i32
    return %arg0, %c0_i32, %c0_i32_0 : i32, i32, i32
  }
}

</mosaic_0001>

<bundles_post_ra>
// kernel: tpu_custom_call.1
= control target key start
LH: loop header
LB: loop body
LE: loop exit
PB: predicated region body
PF: predicated region fallthrough
CT: control target
= control target key end

     0   :  { %s1958_s0 = inlined_call_operand.<no memory space> [shape: s32[1], index: 0, kind: input, shape index: {}]   ;;  %s1959_s1 = inlined_call_operand.vmem [shape: f32[256,16], index: 1, kind: input, shape index: {}]   ;;  %s1960_s2 = inlined_call_operand.vmem [shape: s32[256,1], index: 2, kind: input, shape index: {}]   ;;  %s1961_s3 = inlined_call_operand.hbm [shape: f32[2,8,128], index: 3, kind: output, shape index: {}]  }
   0x1   :  { %8 = sst [smem:[#allocation3]] %s1958_s0 }
   0x2   :  { %9 = vsyncpa [#allocation5], 0 }
   0x3   :  { %11 = vsyncpa [#allocation5 + $0x1], 0  ;;  %s1286_s14 = smov 0   ;;  %s1288_s15 = smov 0  }
   0x4   :  { %s1290_s16 = smov 0   ;;  %s1292_s17 = smov 0  }
   0x5   :  { %s1294_s18 = smov 0   ;;  %s1296_s19 = smov 0  }
   0x6   :  { %s1298_s20 = smov 0   ;;  %s1300_s21 = smov 0  }
   0x7 LB: > { %s940_s0 = sadd.s32 4294967295, %s1257_s21   ;;  %s941_s22 = sadd.s32 4294967294, %s1257_s21   ;;  %s1257_s21 = sphi %s1300_s21, %s17_s21   ;;  %s1253_s20 = sphi %s1298_s20, %s1986_s20   ;;  %s1249_s19 = sphi %s1296_s19, %s1985_s19   ;;  %s1245_s18 = sphi %s1294_s18, %s1984_s18   ;;  %s1241_s17 = sphi %s1292_s17, %s1983_s17   ;;  %s1237_s16 = sphi %s1290_s16, %s1982_s16   ;;  %s1233_s15 = sphi %s1288_s15, %s1981_s15   ;;  %s1229_s14 = sphi %s1286_s14, %s1980_s14  }
   0x8   : > { %s26_s23 = sadd.s32 1, %s1249_s19  ;;  %s29_s24 = sadd.s32 1, %s1253_s20 }
   0x9   : > { %p27_p0 = scmp.ge.s32.totalorder %s26_s23, 2  ;;  %p106_p1 = scmp.ne.s32.totalorder %s1237_s16, %s1233_s15 }
   0xa   : > { %p107_p2 = scmp.eq.s32.totalorder %s940_s0, 3  ;;  %p112_p4 = scmp.ne.s32.totalorder %s1233_s15, %s1229_s14 }
   0xb   : > { %s1988_s23 = smov (%p27_p0, %s26_s23), 0  ;;  %s1990_s24 = smov (!%p27_p0, %s29_s24), %s1253_s20 }
   0xc   : > { %p1335_p3 = por %p107_p2, %p106_p1  ;;  %p31_p5 = scmp.ge.s32.totalorder %s1990_s24, 2 }
   0xd   : > { %p113_p6 = scmp.eq.s32.totalorder %s941_s22, 3  ;;  %p948_p7 = scmp.ge.s32.totalorder %s1257_s21, 1 }
   0xe   : > { %p157_p8 = scmp.lt.s32.totalorder %s1257_s21, 5  ;;  %s1992_s24 = smov (%p31_p5, %s1990_s24), 0 }
   0xf   : > { %p1345_p9 = por %p113_p6, %p112_p4  ;;  %s93_s27 = ssub.s32 %s1253_s20, %s1992_s24 }
  0x10   : > { %p158_p10 = pnand %p948_p7, %p157_p8  ;;  %s96_s28 = sadd.s32 1, %s1237_s16 }
  0x11   : > { %p94_p11 = scmp.eq.s32.totalorder %s93_s27, 0  ;;  %s185_s30 = sand.u32 (!%p158_p10), 1, %s1233_s15  }
  0x12   : > { %161 = sbr.rel (%p158_p10) target bundleno = 678 (0x2a6), region = 28  ;;  %s950_s4 = sshll.u32 (!%p158_p10), %s1245_s18, 1 }
  0x13   : > { %s1353_s29 = scalar_select %p94_p11, %s1237_s16, %s96_s28  }
  0x14   : > { %s949_s5 = sshll.u32 (!%p158_p10), %s185_s30, 3  ;;  %s1360_s6 = sadd.s32 (!%p158_p10), %s1241_s17, %s950_s4 }
  0x15   : > { %s951_s7 = sshll.u32 (!%p158_p10), %s1360_s6, 3  ;;  %s1371_s22 = scalar_lea.vmem (!%p158_p10), [#allocation4], %s949_s5 }
  0x16   : > { %p191_p12 = scmp.lt.s32.totalorder (!%p158_p10), %s951_s7, 31  ;;  %p956_p13 = scmp.ne.s32.totalorder (!%p158_p10), %s1241_s17, 0 }
  0x18   : > { %s1994_s7 = smov (!%p191_p12, %s951_s7), 31  ;;  %211 = sbr.rel (%p956_p13) target bundleno = 31 (0x1f), region = 32 }
  0x19   : > { %s952_s8 = sshll.u32 %s1994_s7, 3 }
  0x1a   : > { %s194_s11 = scalar_lea.vmem %s1959_s1, %s952_s8  ;;  %s1369_s0 = scalar_lea.vmem %s1960_s2, %s952_s8 }
  0x1d   : > { %v1259_v0 = vmov 0.0  }
  0x1e   : > { %212 = vst [vmem:[%s1371_s22] sm:$0xff] %v1259_v0 }
  0x1f PF: > { %v1375_v1 = vld [vmem:[%s194_s11 + $0x38] sm:$0xff]  ;;  %vm229_vm0 = vcmask 130048   ;;  %v1377_v2 = vld [vmem:[%s194_s11 + $0x28] sm:$0xff]  ;;  %v219_v7 = vld [vmem:[%s194_s11 + $0x30] sm:$0xff]  ;;  %v414_v17 = vlaneseq  ;;  %s597_s17 = sld [smem:[#allocation3]]  ;;  %s966_s27 = sshll.u32 %s1360_s6, 6 }
  0x20   : > { %v1379_v3 = vld [vmem:[%s194_s11 + $0x18] sm:$0xff]  ;;  %v251_v4 = vsel %vm229_vm0, %v1375_v1, -inf  ;;  %v245_v5 = vsel %vm229_vm0, %v1377_v2, -inf  ;;  %v1387_v8 = vld [vmem:[%s194_s11 + $0x20] sm:$0xff]  ;;  %v1389_v9 = vld [vmem:[%s194_s11 + $0x10] sm:$0xff]  ;;  %v248_v10 = vsel %vm229_vm0, %v219_v7, -inf }
  0x21   : > { %v239_v6 = vsel %vm229_vm0, %v1379_v3, -inf  ;;  %252 = vmax.xlane.f32.xlu0 %v251_v4  ;;  %246 = vmax.xlane.f32.xlu1 %v245_v5  ;;  %v242_v11 = vsel %vm229_vm0, %v1387_v8, -inf  ;;  %v236_v12 = vsel %vm229_vm0, %v1389_v9, -inf  ;;  %v1396_v13 = vld [vmem:[%s194_s11 + $0x8] sm:$0xff]  ;;  %v1398_v14 = vld [vmem:[%s194_s11] sm:$0xff]  ;;  %v1405_v18 = vand.u32 127, %v414_v17 }
  0x22   : > { %240 = vmax.xlane.f32.xlu2 %v239_v6  ;;  %v233_v15 = vsel %vm229_vm0, %v1396_v13, -inf  ;;  %v230_v16 = vsel %vm229_vm0, %v1398_v14, -inf  ;;  %s1014_s28 = sshll.u32 %s1245_s18, 3  ;;  %s855_s7 = sshll.u32 %s1371_s22, 4  ;;  %s856_s7 = int_to_ptr.vmem [resolvable:$true] %s855_s7 }
  0x23   : > { %s853_s6 = scalar_lea.hbm %s1961_s3, %s1014_s28  ;;  %s843_s9 = scalar_lea.sflag [#allocation5], %s185_s30 }
  0x24   : > { %s857_s8 = sshll.u32 %s853_s6, 4  ;;  %s1183_s13 = scalar_lea.hbm %s1961_s3, 16  ;;  %s858_s8 = int_to_ptr.hbm [resolvable:$true] %s857_s8 }
  0x25   : > { %s1177_s10 = sshra.s32 %s858_s8, 4  ;;  %s1178_s10 = int_to_ptr.hbm [resolvable:$true] %s1177_s10 }
  0x26   : > { %s1179_s18 = scalar_lea.hbm %s1178_s10, 8  ;;  %p1184_p4 = scmp.lt.s32.totalorder %s1178_s10, %s1961_s3 }
  0x27   : > { %p1180_p0 = scmp.ne.s32.totalorder %s1178_s10, %s1179_s18  ;;  %p1185_p5 = scmp.lt.s32.totalorder %s1183_s13, %s1179_s18 }
  0x29   : > { %249 = vmax.xlane.f32.xlu0 %v248_v10  ;;  %243 = vmax.xlane.f32.xlu1 %v242_v11  ;;  %p1181_p1 = pnand %p1180_p0, %p1335_p3  ;;  %p1186_p6 = por %p1185_p5, %p1184_p4 }
  0x2a   : > { %237 = vmax.xlane.f32.xlu2 %v236_v12 }
  0x2b   : > { %p1182_p2 = pneg %p1181_p1 }
  0x2d   : > { %p1187_p7 = pnand %p1186_p6, %p1182_p2 }
  0x31   : > { %234 = vmax.xlane.f32.xlu0 %v233_v15  ;;  %231 = vmax.xlane.f32.xlu1 %v230_v16 }
  0x94   : > { %v253_v19 = vpop.xlane.xlu0 %252  ;;  %v1407_v20 = vpop.xlane.xlu1 %246 }
  0x95   : > { %vm423_vm1 = vcmp.eq.f32.partialorder %v1375_v1, %v253_v19  ;;  %vm421_vm2 = vcmp.eq.f32.partialorder %v1377_v2, %v1407_v20  ;;  %v241_v21 = vpop.xlane.xlu2 %240  ;;  %v261_v45 = vsub.f32 %v1375_v1, %v253_v19  ;;  %v259_v60 = vsub.f32 %v1377_v2, %v1407_v20 }
  0x96   : > { %v431_v22 = vsel %vm423_vm1, %v1405_v18, 16  ;;  %v429_v23 = vsel %vm421_vm2, %v1405_v18, 16  ;;  %vm419_vm5 = vcmp.eq.f32.partialorder %v1379_v3, %v241_v21  ;;  %v257_v48 = vsub.f32 %v1379_v3, %v241_v21 }
  0x97   : > { %v1415_v24 = vsel %vm229_vm0, %v431_v22, 2147483647  ;;  %v1418_v25 = vsel %vm229_vm0, %v429_v23, 2147483647  ;;  %v427_v40 = vsel %vm419_vm5, %v1405_v18, 16 }
  0x98   : > { %v539_v26 = vshra.s32 %v1415_v24, 16  ;;  %v509_v27 = vshra.s32 %v1418_v25, 16  ;;  %v1459_v51 = vsel %vm229_vm0, %v427_v40, 2147483647  ;;  %v276_v54 = vmul.f32 1.442695, %v261_v45 }
  0x99   : > { %v479_v55 = vshra.s32 %v1459_v51, 16  ;;  %v268_v57 = vmul.f32 1.442695, %v257_v48  ;;  %v272_v4 = vmul.f32 1.442695, %v259_v60 }
  0x9a   : > { %v1422_v28 = vcvt.s32.f32 %v539_v26  ;;  %v1424_v29 = vcvt.s32.f32 %v509_v27 }
  0x9b   : > { %v1482_v3 = vcvt.s32.f32 %v479_v55 }
  0x9c   : > { %v250_v30 = vpop.xlane.xlu0 %249  ;;  %v244_v31 = vpop.xlane.xlu1 %243  ;;  %542 = vmin.xlane.f32.xlu2 %v1422_v28  ;;  %512 = vmin.xlane.f32.xlu1 %v1424_v29 }
  0x9d   : > { %v260_v32 = vsub.f32 %v219_v7, %v250_v30  ;;  %vm422_vm3 = vcmp.eq.f32.partialorder %v219_v7, %v250_v30  ;;  %vm420_vm4 = vcmp.eq.f32.partialorder %v1387_v8, %v244_v31  ;;  %v1428_v33 = vpop.xlane.xlu2 %237  ;;  %v258_v1 = vsub.f32 %v1387_v8, %v244_v31 }
  0x9e   : > { %v430_v34 = vsel %vm422_vm3, %v1405_v18, 16  ;;  %v428_v35 = vsel %vm420_vm4, %v1405_v18, 16  ;;  %vm418_vm6 = vcmp.eq.f32.partialorder %v1389_v9, %v1428_v33 }
  0x9f   : > { %v426_v36 = vsel %vm418_vm6, %v1405_v18, 16  ;;  %v274_v37 = vmul.f32 1.442695, %v260_v32  ;;  %v1438_v38 = vsel %vm229_vm0, %v428_v35, 2147483647 }
  0xa0   : > { %v1441_v39 = vsel %vm229_vm0, %v430_v34, 2147483647  ;;  %v494_v41 = vshra.s32 %v1438_v38, 16  ;;  %v1447_v43 = vsel %vm229_vm0, %v426_v36, 2147483647  ;;  %v508_v34 = vand.u32 65535, %v1418_v25 }
  0xa1   : > { %v524_v42 = vshra.s32 %v1441_v39, 16  ;;  %v464_v44 = vshra.s32 %v1447_v43, 16  ;;  %1131 = vpow2.f32 %v274_v37  ;;  %v270_v7 = vmul.f32 1.442695, %v258_v1 }
  0xa2   : > { %v1451_v46 = vcvt.s32.f32 %v494_v41  ;;  %1133 = vpow2.f32 %v276_v54  ;;  %v510_v40 = vcvt.s32.f32 %v508_v34  ;;  %v493_v25 = vand.u32 65535, %v1438_v38 }
  0xa3   : > { %v1453_v47 = vcvt.s32.f32 %v524_v42  ;;  %v1456_v50 = vcvt.s32.f32 %v464_v44  ;;  %1135 = vpow2.f32 %v268_v57  ;;  %v463_v44 = vand.u32 65535, %v1447_v43 }
  0xa4   : > { %v235_v49 = vpop.xlane.xlu0 %234  ;;  %v232_v52 = vpop.xlane.xlu1 %231  ;;  %497 = vmin.xlane.f32.xlu2 %v1451_v46  ;;  %1137 = vpow2.f32 %v272_v4  ;;  %v478_v43 = vand.u32 65535, %v1459_v51 }
  0xa5   : > { %527 = vmin.xlane.f32.xlu0 %v1453_v47  ;;  %vm417_vm7 = vcmp.eq.f32.partialorder %v1396_v13, %v235_v49  ;;  %467 = vmin.xlane.f32.xlu1 %v1456_v50  ;;  %vm416_vm8 = vcmp.eq.f32.partialorder %v1398_v14, %v232_v52  ;;  %v254_v63 = vsub.f32 %v1398_v14, %v232_v52 }
  0xa6   : > { %v425_v53 = vsel %vm417_vm7, %v1405_v18, 16  ;;  %v424_v59 = vsel %vm416_vm8, %v1405_v18, 16  ;;  %v255_v11 = vsub.f32 %v1396_v13, %v235_v49  ;;  %v256_v14 = vsub.f32 %v1389_v9, %v1428_v33 }
  0xa7   : > { %v1469_v56 = vsel %vm229_vm0, %v425_v53, 2147483647  ;;  %v1132_v61 = vpop.eup %1131  ;;  %v1479_v0 = vsel %vm229_vm0, %v424_v59, 2147483647  ;;  %v262_v6 = vmul.f32 1.442695, %v254_v63 }
  0xa8   : > { %v449_v58 = vshra.s32 %v1469_v56, 16  ;;  %v296_v2 = vsel %vm229_vm0, %v1132_v61, 0.0  ;;  %v434_v5 = vshra.s32 %v1479_v0, 16  ;;  %v1134_v10 = vpop.eup %1133  ;;  %v264_v16 = vmul.f32 1.442695, %v255_v11 }
  0xa9   : > { %v1136_v12 = vpop.eup %1135  ;;  %1139 = vpow2.f32 %v262_v6  ;;  %v299_v15 = vsel %vm229_vm0, %v1134_v10, 0.0  ;;  %v266_v21 = vmul.f32 1.442695, %v256_v14  ;;  %v538_v33 = vand.u32 65535, %v1415_v24 }
  0xaa   : > { %v1475_v62 = vcvt.s32.f32 %v449_v58  ;;  %v1489_v8 = vcvt.s32.f32 %v434_v5  ;;  %1141 = vpow2.f32 %v270_v7  ;;  %v287_v19 = vsel %vm229_vm0, %v1136_v12, 0.0  ;;  %v1138_v20 = vpop.eup %1137 }
  0xab   : > { %1143 = vpow2.f32 %v264_v16  ;;  %v293_v26 = vsel %vm229_vm0, %v1138_v20, 0.0  ;;  %v540_v36 = vcvt.s32.f32 %v538_v33  ;;  %v523_v24 = vand.u32 65535, %v1441_v39 }
  0xac   : > { %452 = vmin.xlane.f32.xlu2 %v1475_v62  ;;  %1145 = vpow2.f32 %v266_v21  ;;  %v448_v54 = vand.u32 65535, %v1469_v56  ;;  %v433_v51 = vand.u32 65535, %v1479_v0  ;;  %v1538_v56 = vshrl.u32 %v414_v17, 7 }
  0xad   : > { %482 = vmin.xlane.f32.xlu0 %v1482_v3  ;;  %297 = vadd.xlane.f32.xlu1 %v296_v2  ;;  %v525_v49 = vcvt.s32.f32 %v523_v24  ;;  %v1557_v12 = vstv %s597_s17 }
  0xae   : > { %v450_v57 = vcvt.s32.f32 %v448_v54  ;;  %v435_v1 = vcvt.s32.f32 %v433_v51  ;;  %v584_v17 = vadd.s32 56, %v1538_v56  ;;  %v580_v20 = vadd.s32 24, %v1538_v56 }
  0xaf   : > { %v1140_v13 = vpop.eup %1139 }
  0xb0   : > { %v1142_v22 = vpop.eup %1141  ;;  %v278_v23 = vsel %vm229_vm0, %v1140_v13, 0.0 }
  0xb1   : > { %v290_v9 = vsel %vm229_vm0, %v1142_v22, 0.0  ;;  %v1144_v27 = vpop.eup %1143  ;;  %v582_v22 = vadd.s32 40, %v1538_v56 }
  0xb2   : > { %v1146_v30 = vpop.eup %1145  ;;  %v281_v31 = vsel %vm229_vm0, %v1144_v27, 0.0 }
  0xb3   : > { %v284_v32 = vsel %vm229_vm0, %v1146_v30, 0.0  ;;  %v1664_v30 = vadd.s32 16, %v1538_v56 }
  0xb4   : > { %300 = vadd.xlane.f32.xlu2 %v299_v15 }
  0xb5   : > { %437 = vmin.xlane.f32.xlu0 %v1489_v8  ;;  %288 = vadd.xlane.f32.xlu1 %v287_v19 }
  0xbc   : > { %294 = vadd.xlane.f32.xlu2 %v293_v26 }
  0xbd   : > { %291 = vadd.xlane.f32.xlu0 %v290_v9  ;;  %279 = vadd.xlane.f32.xlu1 %v278_v23 }
  0xc4   : > { %285 = vadd.xlane.f32.xlu2 %v284_v32 }
  0xc5   : > { %282 = vadd.xlane.f32.xlu0 %v281_v31 }
 0x10f   : > { %v1503_v35 = vpop.xlane.xlu2 %542  ;;  %v1505_v37 = vpop.xlane.xlu1 %512 }
 0x110   : > { %vm544_vm9 = vcmp.eq.f32.partialorder %v1422_v28, %v1503_v35  ;;  %vm514_vm10 = vcmp.eq.f32.partialorder %v1424_v29, %v1505_v37  ;;  %v495_v28 = vcvt.s32.f32 %v493_v25  ;;  %v465_v29 = vcvt.s32.f32 %v463_v44 }
 0x111   : > { %v545_v41 = vsel %vm544_vm9, %v540_v36, inf  ;;  %v515_v42 = vsel %vm514_vm10, %v510_v40, inf  ;;  %v581_v36 = vadd.s32 32, %v1538_v56 }
 0x112   : > { %546 = vmin.xlane.f32.xlu1 %v545_v41  ;;  %516 = vmin.xlane.f32.xlu0 %v515_v42 }
 0x117   : > { %v1514_v45 = vpop.xlane.xlu2 %497 }
 0x118   : > { %v1516_v48 = vpop.xlane.xlu0 %527  ;;  %v1518_v52 = vpop.xlane.xlu1 %467  ;;  %vm499_vm12 = vcmp.eq.f32.partialorder %v1451_v46, %v1514_v45  ;;  %v480_v46 = vcvt.s32.f32 %v478_v43 }
 0x119   : > { %vm529_vm11 = vcmp.eq.f32.partialorder %v1453_v47, %v1516_v48  ;;  %v500_v53 = vsel %vm499_vm12, %v495_v28, inf  ;;  %vm469_vm13 = vcmp.eq.f32.partialorder %v1456_v50, %v1518_v52 }
 0x11a   : > { %v530_v39 = vsel %vm529_vm11, %v525_v49, inf  ;;  %501 = vmin.xlane.f32.xlu1 %v500_v53  ;;  %v470_v38 = vsel %vm469_vm13, %v465_v29, inf }
 0x11b   : > { %531 = vmin.xlane.f32.xlu2 %v530_v39  ;;  %471 = vmin.xlane.f32.xlu0 %v470_v38 }
 0x11f   : > { %v1528_v55 = vpop.xlane.xlu2 %452 }
 0x120   : > { %v1530_v47 = vpop.xlane.xlu0 %482  ;;  %v298_v58 = vpop.xlane.xlu1 %297  ;;  %vm454_vm15 = vcmp.eq.f32.partialorder %v1475_v62, %v1528_v55  ;;  %v583_v62 = vadd.s32 48, %v1538_v56 }
 0x121   : > { %vm484_vm14 = vcmp.eq.f32.partialorder %v1482_v3, %v1530_v47  ;;  %1147 = vrcp.f32 %v298_v58  ;;  %v455_v59 = vsel %vm454_vm15, %v450_v57, inf  ;;  %v1545_v3 = vstv %s966_s27 }
 0x122   : > { %v485_v50 = vsel %vm484_vm14, %v480_v46, inf  ;;  %456 = vmin.xlane.f32.xlu1 %v455_v59  ;;  %v395_v5 = vand.u32 2147483647, %v298_v58  ;;  %v397_v6 = vand.u32 2147483648, %v298_v58  ;;  %vm391_vm1 = vweird.f32 %v298_v58 }
 0x123   : > { %486 = vmin.xlane.f32.xlu2 %v485_v50  ;;  %v1563_v15 = vadd.s32 %v1545_v3, %v584_v17  ;;  %v1601_v49 = vadd.s32 %v1545_v3, %v582_v22  ;;  %v1604_v28 = vadd.s32 %v1545_v3, %v580_v20  ;;  %v1615_v46 = vadd.s32 %v1545_v3, %v581_v36 }
 0x124   : > { %vm1565_vm3 = vcmp.eq.f32.partialorder %v395_v5, 8.507059e+37  ;;  %v398_v19 = vor.u32 1.1754944e-38, %v397_v6 }
 0x127   : > { %v1148_v60 = vpop.eup %1147  ;;  %v1541_v61 = vpop.xlane.xlu2 %300 }
 0x128   : > { %v1543_v63 = vpop.xlane.xlu0 %437  ;;  %v387_v4 = vmul.f32 %v1148_v60, %v298_v58  ;;  %1149 = vrcp.f32 %v1541_v61  ;;  %v1549_v2 = vpop.xlane.xlu1 %288  ;;  %v409_v10 = vand.u32 2147483647, %v1541_v61  ;;  %v411_v11 = vand.u32 2147483648, %v1541_v61 }
 0x129   : > { %vm439_vm0 = vcmp.eq.f32.partialorder %v1489_v8, %v1543_v63  ;;  %1151 = vrcp.f32 %v1549_v2  ;;  %vm392_vm2 = vweird.f32 %v1148_v60  ;;  %v1560_v8 = vadd.s32 %v1545_v3, %v583_v62 }
 0x12a   : > { %v440_v0 = vsel %vm439_vm0, %v435_v1, inf  ;;  %v388_v7 = vsub.f32 1.0, %v387_v4  ;;  %vm405_vm4 = vweird.f32 %v1541_v61  ;;  %vm1579_vm5 = vcmp.eq.f32.partialorder %v409_v10, 8.507059e+37  ;;  %vm393_vm6 = vmor %vm391_vm1, %vm392_vm2 }
 0x12b   : > { %441 = vmin.xlane.f32.xlu0 %v440_v0  ;;  %v412_v31 = vor.u32 1.1754944e-38, %v411_v11  ;;  %v353_v32 = vand.u32 2147483647, %v1549_v2  ;;  %vm349_vm7 = vweird.f32 %v1549_v2  ;;  %v355_v24 = vand.u32 2147483648, %v1549_v2 }
 0x12c   : > { %v389_v14 = vmul.f32 %v1148_v60, %v388_v7  ;;  %vm605_vm0 = vcmp.lt.s32.totalorder %v1560_v8, %v1557_v12  ;;  %vm606_vm2 = vcmp.lt.s32.totalorder %v1563_v15, %v1557_v12  ;;  %v1260_v15 = vmov 1.0  }
 0x12d   : > { %vm1608_vm9 = vcmp.eq.f32.partialorder %v353_v32, 8.507059e+37  ;;  %v356_v59 = vor.u32 1.1754944e-38, %v355_v24 }
 0x12e   : > { %v1150_v21 = vpop.eup %1149  ;;  %v390_v13 = vadd.f32 %v1148_v60, %v389_v14 }
 0x12f   : > { %v1572_v23 = vpop.eup %1151  ;;  %v401_v26 = vmul.f32 %v1150_v21, %v1541_v61  ;;  %v1575_v9 = vpop.xlane.xlu2 %294  ;;  %vm406_vm8 = vweird.f32 %v1150_v21 }
 0x130   : > { %v1577_v27 = vpop.xlane.xlu0 %291  ;;  %v345_v33 = vmul.f32 %v1572_v23, %v1549_v2  ;;  %1153 = vrcp.f32 %v1575_v9  ;;  %v394_v34 = vsel %vm393_vm6, %v1148_v60, %v390_v13  ;;  %v1592_v41 = vpop.xlane.xlu1 %279  ;;  %v381_v39 = vand.u32 2147483647, %v1575_v9  ;;  %vm1621_vm10 = vmor %vm405_vm4, %vm406_vm8 }
 0x131   : > { %v402_v40 = vsub.f32 1.0, %v401_v26  ;;  %1155 = vrcp.f32 %v1577_v27  ;;  %v1596_v42 = vsel %vm1565_vm3, %v398_v19, %v394_v34  ;;  %v383_v53 = vand.u32 2147483648, %v1575_v9 }
 0x132   : > { %v346_v25 = vsub.f32 1.0, %v345_v33  ;;  %v613_v44 = vmul.f32 15.0, %v1596_v42  ;;  %1157 = vrcp.f32 %v1592_v41  ;;  %v367_v54 = vand.u32 2147483647, %v1577_v27 }
 0x133   : > { %v403_v29 = vmul.f32 %v1150_v21, %v402_v40  ;;  %v369_v58 = vand.u32 2147483648, %v1577_v27  ;;  %vm377_vm11 = vweird.f32 %v1575_v9  ;;  %vm363_vm12 = vweird.f32 %v1577_v27 }
 0x134   : > { %v621_v43 = vceil.f32 %v613_v44  ;;  %v347_v50 = vmul.f32 %v1572_v23, %v346_v25  ;;  %vm350_vm13 = vweird.f32 %v1572_v23  ;;  %vm1635_vm14 = vcmp.eq.f32.partialorder %v381_v39, 8.507059e+37 }
 0x135   : > { %v404_v57 = vadd.f32 %v1150_v21, %v403_v29  ;;  %v384_v6 = vor.u32 1.1754944e-38, %v383_v53  ;;  %vm1646_vm15 = vcmp.eq.f32.partialorder %v367_v54, 8.507059e+37  ;;  %vm351_vm1 = vmor %vm349_vm7, %vm350_vm13  ;;  %vm603_vm13 = vcmp.lt.s32.totalorder %v1615_v46, %v1557_v12 }
 0x136   : > { %v1154_v51 = vpop.eup %1153  ;;  %v1030_v1 = vcvt.f32.s32 %v621_v43  ;;  %v348_v7 = vadd.f32 %v1572_v23, %v347_v50 }
 0x137   : > { %v1156_v62 = vpop.eup %1155  ;;  %v373_v4 = vmul.f32 %v1154_v51, %v1575_v9  ;;  %v1629_v17 = vpop.xlane.xlu2 %285  ;;  %v408_v61 = vsel %vm1621_vm10, %v1150_v21, %v404_v57  ;;  %v370_v21 = vor.u32 1.1754944e-38, %v369_v58  ;;  %vm378_vm4 = vweird.f32 %v1154_v51 }
 0x138   : > { %v1631_v0 = vpop.xlane.xlu0 %282  ;;  %v359_v10 = vmul.f32 %v1156_v62, %v1577_v27  ;;  %1159 = vrcp.f32 %v1629_v17  ;;  %v1644_v11 = vsel %vm1579_vm5, %v412_v31, %v408_v61  ;;  %v973_v14 = vadd.s32 4294967295, %v1030_v1  ;;  %v1658_v13 = vpop.eup %1157  ;;  %vm379_vm7 = vmor %vm377_vm11, %vm378_vm4 }
 0x139   : > { %v374_v19 = vsub.f32 1.0, %v373_v4  ;;  %1161 = vrcp.f32 %v1631_v0  ;;  %v614_v20 = vmul.f32 15.0, %v1644_v11  ;;  %v352_v26 = vsel %vm351_vm1, %v1572_v23, %v348_v7 }
 0x13a   : > { %v360_v22 = vsub.f32 1.0, %v359_v10  ;;  %vm651_vm3 = vcmp.gt.s32.totalorder %v973_v14, 0  ;;  %vm364_vm6 = vweird.f32 %v1156_v62  ;;  %v1668_v2 = vsel %vm1608_vm9, %v356_v59, %v352_v26 }
 0x13b   : > { %v622_v31 = vceil.f32 %v614_v20  ;;  %v652_v32 = vsel %vm651_vm3, %v973_v14, 0  ;;  %v375_v33 = vmul.f32 %v1154_v51, %v374_v19  ;;  %v1672_v36 = vmul.f32 %v1658_v13, %v1592_v41  ;;  %vm365_vm9 = vmor %vm363_vm12, %vm364_vm6 }
 0x13c   : > { %vm667_vm5 = vcmp.lt.s32.totalorder %v652_v32, 14  ;;  %v361_v34 = vmul.f32 %v1156_v62, %v360_v22  ;;  %v610_v24 = vmul.f32 15.0, %v1668_v2  ;;  %vm335_vm8 = vweird.f32 %v1629_v17 }
 0x13d   : > { %v1032_v40 = vcvt.f32.s32 %v622_v31  ;;  %v376_v23 = vadd.f32 %v1154_v51, %v375_v33  ;;  %v668_v44 = vsel %vm667_vm5, %v652_v32, 14  ;;  %v339_v39 = vand.u32 2147483647, %v1629_v17 }
 0x13e   : > { %v1160_v25 = vpop.eup %1159  ;;  %v362_v29 = vadd.f32 %v1156_v62, %v361_v34  ;;  %v341_v57 = vand.u32 2147483648, %v1629_v17  ;;  %v618_v59 = vceil.f32 %v610_v24  ;;  %vm604_vm11 = vcmp.lt.s32.totalorder %v1601_v49, %v1557_v12 }
 0x13f   : > { %v1679_v53 = vpop.eup %1161  ;;  %v331_v38 = vmul.f32 %v1160_v25, %v1629_v17  ;;  %v974_v43 = vadd.s32 4294967295, %v1032_v40  ;;  %v380_v54 = vsel %vm379_vm7, %v1154_v51, %v376_v23  ;;  %vm336_vm1 = vweird.f32 %v1160_v25 }
 0x140   : > { %v317_v9 = vmul.f32 %v1679_v53, %v1631_v0  ;;  %v1690_v58 = vsel %vm1635_vm14, %v384_v6, %v380_v54  ;;  %v366_v50 = vsel %vm365_vm9, %v1156_v62, %v362_v29  ;;  %v1024_v5 = vcvt.f32.s32 %v618_v59 }
 0x141   : > { %v332_v60 = vsub.f32 1.0, %v331_v38  ;;  %vm653_vm10 = vcmp.gt.s32.totalorder %v974_v43, 0  ;;  %v612_v1 = vmul.f32 15.0, %v1690_v58  ;;  %v1695_v51 = vsel %vm1646_vm15, %v370_v21, %v366_v50 }
 0x142   : > { %v318_v27 = vsub.f32 1.0, %v317_v9  ;;  %v654_v4 = vsel %vm653_vm10, %v974_v43, 0  ;;  %v611_v61 = vmul.f32 15.0, %v1695_v51  ;;  %vm602_vm14 = vcmp.lt.s32.totalorder %v1604_v28, %v1557_v12 }
 0x143   : > { %vm669_vm12 = vcmp.lt.s32.totalorder %v654_v4, 14  ;;  %v620_v6 = vceil.f32 %v612_v1  ;;  %v333_v62 = vmul.f32 %v1160_v25, %v332_v60  ;;  %v1707_v10 = vsel %vm605_vm0, %v668_v44, 127  ;;  %vm337_vm0 = vmor %vm335_vm8, %vm336_vm1 }
 0x144   : > { %v670_v7 = vsel %vm669_vm12, %v654_v4, 14  ;;  %v619_v14 = vceil.f32 %v611_v61  ;;  %v970_v16 = vadd.s32 4294967295, %v1024_v5  ;;  %vm1714_vm15 = vcmp.eq.f32.partialorder %v339_v39, 8.507059e+37 }
 0x145   : > { %v1712_v19 = vsel %vm606_vm2, %v670_v7, 127  ;;  %v1028_v20 = vcvt.f32.s32 %v620_v6  ;;  %v334_v21 = vadd.f32 %v1160_v25, %v333_v62  ;;  %v342_v8 = vor.u32 1.1754944e-38, %v341_v57 }
 0x146   : > { %vm686_vm3 = vcmp.eq.s32.totalorder %v1405_v18, %v1712_v19  ;;  %v1026_v26 = vcvt.f32.s32 %v619_v14  ;;  %vm645_vm4 = vcmp.gt.s32.totalorder %v970_v16, 0  ;;  %vm307_vm5 = vweird.f32 %v1592_v41 }
 0x147   : > { %986 = vmatpush.msk.msra.mxu0 %vm686_vm3, %v1644_v11  ;;  %995 = vmatpush.msk.msra.mxu1 %vm686_vm3, %v1260_v15  ;;  %v972_v31 = vadd.s32 4294967295, %v1028_v20  ;;  %v646_v32 = vsel %vm645_vm4, %v970_v16, 0  ;;  %v338_v33 = vsel %vm337_vm0, %v1160_v25, %v334_v21  ;;  %v319_v17 = vmul.f32 %v1679_v53, %v318_v27 }
 0x148   : > { %vm685_vm2 = vcmp.eq.s32.totalorder %v1405_v18, %v1707_v10  ;;  %v971_v34 = vadd.s32 4294967295, %v1026_v26  ;;  %vm661_vm6 = vcmp.lt.s32.totalorder %v646_v32, 14  ;;  %v343_v40 = vsel %vm1714_vm15, %v342_v8, %v338_v33 }
 0x149   : > { %v304_v11 = vsub.f32 1.0, %v1672_v36  ;;  %987 = vmatpush.msk.msra.mxu0 %vm685_vm2, %v1596_v42  ;;  %996 = vmatpush.msk.msra.mxu1 %vm685_vm2, %v1260_v15  ;;  %vm649_vm7 = vcmp.gt.s32.totalorder %v972_v31, 0  ;;  %v591_v23 = vadd.s32 %v1545_v3, %v1664_v30  ;;  %v609_v24 = vmul.f32 15.0, %v343_v40 }
 0x14a   : > { %v650_v25 = vsel %vm649_vm7, %v972_v31, 0  ;;  %vm647_vm8 = vcmp.gt.s32.totalorder %v971_v34, 0  ;;  %v320_v44 = vadd.f32 %v1679_v53, %v319_v17  ;;  %vm321_vm9 = vweird.f32 %v1631_v0 }
 0x14b   : > { %vm665_vm10 = vcmp.lt.s32.totalorder %v650_v25, 14  ;;  %v648_v36 = vsel %vm647_vm8, %v971_v34, 0  ;;  %v662_v29 = vsel %vm661_vm6, %v646_v32, 14  ;;  %v617_v42 = vceil.f32 %v609_v24 }
 0x14c   : > { %v666_v39 = vsel %vm665_vm10, %v650_v25, 14  ;;  %vm663_vm12 = vcmp.lt.s32.totalorder %v648_v36, 14  ;;  %vm322_vm1 = vweird.f32 %v1679_v53  ;;  %v325_v38 = vand.u32 2147483647, %v1631_v0 }
 0x14d   : > { %v1754_v30 = vsel %vm604_vm11, %v666_v39, 127  ;;  %v664_v43 = vsel %vm663_vm12, %v648_v36, 14  ;;  %v1022_v54 = vcvt.f32.s32 %v617_v42  ;;  %vm1756_vm15 = vmor %vm321_vm9, %vm322_vm1  ;;  %v327_v9 = vand.u32 2147483648, %v1631_v0 }
 0x14e   : > { %vm684_vm4 = vcmp.eq.s32.totalorder %v1405_v18, %v1754_v30  ;;  %v1766_v50 = vsel %vm603_vm13, %v664_v43, 127  ;;  %v1771_v49 = vsel %vm602_vm14, %v662_v29, 127  ;;  %v324_v59 = vsel %vm1756_vm15, %v1679_v53, %v320_v44 }
 0x14f   : > { %988 = vmatpush.msk.msra.mxu0 %vm684_vm4, %v1690_v58  ;;  %997 = vmatpush.msk.msra.mxu1 %vm684_vm4, %v1260_v15  ;;  %vm683_vm11 = vcmp.eq.s32.totalorder %v1405_v18, %v1766_v50  ;;  %v969_v28 = vadd.s32 4294967295, %v1022_v54  ;;  %vm326_vm13 = vcmp.eq.f32.partialorder %v325_v38, 8.507059e+37  ;;  %v328_v46 = vor.u32 1.1754944e-38, %v327_v9  ;;  %v228_v38 = vld [vmem:[%s1369_s0 + $0x38] sm:$0xff] }
 0x150   : > { %v305_v0 = vmul.f32 %v1658_v13, %v304_v11  ;;  %vm308_vm14 = vweird.f32 %v1658_v13  ;;  %v311_v53 = vand.u32 2147483647, %v1592_v41  ;;  %v313_v60 = vand.u32 2147483648, %v1592_v41 }
 0x151   : > { %989 = vmatpush.msk.msra.mxu0 %vm683_vm11, %v1695_v51  ;;  %998 = vmatpush.msk.msra.mxu1 %vm683_vm11, %v1260_v15  ;;  %vm682_vm0 = vcmp.eq.s32.totalorder %v1405_v18, %v1771_v49  ;;  %vm601_vm6 = vcmp.lt.s32.totalorder %v591_v23, %v1557_v12  ;;  %vm643_vm7 = vcmp.gt.s32.totalorder %v969_v28, 0  ;;  %v329_v58 = vsel %vm326_vm13, %v328_v46, %v324_v59  ;;  %vm309_vm8 = vmor %vm307_vm5, %vm308_vm14 }
 0x152   : > { %v644_v1 = vsel %vm643_vm7, %v969_v28, 0  ;;  %v608_v27 = vmul.f32 15.0, %v329_v58  ;;  %v306_v4 = vadd.f32 %v1658_v13, %v305_v0  ;;  %vm312_vm9 = vcmp.eq.f32.partialorder %v311_v53, 8.507059e+37  ;;  %v227_v0 = vld [vmem:[%s1369_s0 + $0x30] sm:$0xff]  ;;  %v225_v53 = vld [vmem:[%s1369_s0 + $0x20] sm:$0xff] }
 0x153   : > { %990 = vmatpush.msk.msra.mxu0 %vm682_vm0, %v1668_v2  ;;  %999 = vmatpush.msk.msra.mxu1 %vm682_vm0, %v1260_v15  ;;  %vm659_vm10 = vcmp.lt.s32.totalorder %v644_v1, 14  ;;  %v578_v51 = vadd.s32 8, %v1538_v56  ;;  %v314_v41 = vor.u32 1.1754944e-38, %v313_v60  ;;  %v589_v26 = vadd.s32 %v1545_v3, %v1538_v56 }
 0x154   : > { %v660_v61 = vsel %vm659_vm10, %v644_v1, 14  ;;  %v616_v5 = vceil.f32 %v608_v27  ;;  %v310_v6 = vsel %vm309_vm8, %v1658_v13, %v306_v4  ;;  %v549_v34 = vcvt.f32.s32 %v1503_v35  ;;  %v226_v35 = vld [vmem:[%s1369_s0 + $0x28] sm:$0xff] }
 0x155   : > { %v1816_v62 = vsel %vm601_vm6, %v660_v61, 127  ;;  %v315_v7 = vsel %vm312_vm9, %v314_v41, %v310_v6  ;;  %v590_v13 = vadd.s32 %v1545_v3, %v578_v51  ;;  %vm599_vm6 = vcmp.lt.s32.totalorder %v589_v26, %v1557_v12 }
 0x156   : > { %vm681_vm5 = vcmp.eq.s32.totalorder %v1405_v18, %v1816_v62  ;;  %v1020_v2 = vcvt.f32.s32 %v616_v5  ;;  %v607_v14 = vmul.f32 15.0, %v315_v7  ;;  %v519_v11 = vcvt.f32.s32 %v1505_v37 }
 0x157   : > { %991 = vmatpush.msk.msra.mxu0 %vm681_vm5, %v343_v40  ;;  %1000 = vmatpush.msk.msra.mxu1 %vm681_vm5, %v1260_v15  ;;  %vm600_vm1 = vcmp.lt.s32.totalorder %v590_v13, %v1557_v12  ;;  %v1261_v12 = vmov 0   ;;  %v550_v44 = vshll.u32 %v549_v34, 16  ;;  %v504_v29 = vcvt.f32.s32 %v1514_v45 }
 0x158   : > { %v968_v16 = vadd.s32 4294967295, %v1020_v2  ;;  %v615_v20 = vceil.f32 %v607_v14  ;;  %1114 = vset.pattern.permute.xlu0 %v1261_v12  ;;  %1108 = vset.pattern.permute.xlu2 %v1261_v12  ;;  %v520_v36 = vshll.u32 %v519_v11, 16  ;;  %v474_v43 = vcvt.f32.s32 %v1518_v52 }
 0x159   : > { %1120 = vset.pattern.permute.xlu1 %v1261_v12  ;;  %v505_v37 = vshll.u32 %v504_v29, 16  ;;  %v489_v1 = vcvt.f32.s32 %v1530_v47  ;;  %v1262_v52 = vmov 0.0   ;;  %v459_v47 = vcvt.f32.s32 %v1528_v55  ;;  %v222_v12 = vld [vmem:[%s1369_s0 + $0x8] sm:$0xff] }
 0x15a   : > { %vm641_vm12 = vcmp.gt.s32.totalorder %v968_v16, 0  ;;  %v1018_v21 = vcvt.f32.s32 %v615_v20  ;;  %v224_v20 = vld [vmem:[%s1369_s0 + $0x18] sm:$0xff] }
 0x15b   : > { %v642_v22 = vsel %vm641_vm12, %v968_v16, 0  ;;  %v490_v13 = vshll.u32 %v489_v1, 16  ;;  %v460_v26 = vshll.u32 %v459_v47, 16 }
 0x15c   : > { %vm657_vm15 = vcmp.lt.s32.totalorder %v642_v22, 14  ;;  %v967_v8 = vadd.s32 4294967295, %v1018_v21 }
 0x15d   : > { %v658_v31 = vsel %vm657_vm15, %v642_v22, 14 }
 0x15e   : > { %v1831_v32 = vsel %vm600_vm1, %v658_v31, 127  ;;  %vm639_vm13 = vcmp.gt.s32.totalorder %v967_v8, 0 }
 0x15f   : > { %vm680_vm14 = vcmp.eq.s32.totalorder %v1405_v18, %v1831_v32  ;;  %v640_v33 = vsel %vm639_vm13, %v967_v8, 0  ;;  %v444_v8 = vcvt.f32.s32 %v1543_v63 }
 0x160   : > { %992 = vmatpush.msk.msra.mxu0 %vm680_vm14, %v329_v58  ;;  %1001 = vmatpush.msk.msra.mxu1 %vm680_vm14, %v1260_v15  ;;  %vm655_vm7 = vcmp.lt.s32.totalorder %v640_v33, 14  ;;  %v475_v58 = vshll.u32 %v474_v43, 16 }
 0x161   : > { %v656_v3 = vsel %vm655_vm7, %v640_v33, 14 }
 0x162   : > { %v1843_v17 = vsel %vm599_vm6, %v656_v3, 127 }
 0x163   : > { %vm679_vm8 = vcmp.eq.s32.totalorder %v1405_v18, %v1843_v17 }
 0x164   : > { %993 = vmatpush.msk.msra.mxu0 %vm679_vm8, %v315_v7  ;;  %1002 = vmatpush.msk.msra.mxu1 %vm679_vm8, %v1260_v15  ;;  %v534_v15 = vcvt.f32.s32 %v1516_v48  ;;  %v223_v7 = vld [vmem:[%s1369_s0 + $0x10] sm:$0xff] }
 0x166   : > { %v535_v9 = vshll.u32 %v534_v15, 16 }
 0x185   : > { %v547_v40 = vpop.xlane.xlu1 %546  ;;  %v517_v23 = vpop.xlane.xlu0 %516 }
 0x186   : > { %v548_v24 = vcvt.f32.s32 %v547_v40  ;;  %v518_v25 = vcvt.f32.s32 %v517_v23  ;;  %v445_v40 = vshll.u32 %v444_v8, 16  ;;  %v221_v23 = vld [vmem:[%s1369_s0] sm:$0xff] }
 0x188   : > { %v551_v42 = vadd.s32 %v550_v44, %v548_v24  ;;  %v521_v39 = vadd.s32 %v520_v36, %v518_v25 }
 0x18a   : > { %vm559_vm9 = vcmp.eq.s32.totalorder %v551_v42, %v228_v38  ;;  %vm557_vm10 = vcmp.eq.s32.totalorder %v521_v39, %v226_v35 }
 0x18b   : > { %v964_v4 = vsel %vm559_vm9, 1.0, %v1262_v52  ;;  %v962_v41 = vsel %vm557_vm10, 1.0, %v1262_v52  ;;  %vm762_vm9 = vcmp.eq.s32.totalorder %v1538_v56, 1  ;;  %vm759_vm10 = vcmp.eq.s32.totalorder %v1538_v56, 0 }
 0x18c   : > { %v984_v42 = vsel %vm762_vm9, 1.0, %v1262_v52  ;;  %v983_v39 = vsel %vm759_vm10, 1.0, %v1262_v52 }
 0x18d   : > { %v502_v57 = vpop.xlane.xlu1 %501 }
 0x18e   : > { %v532_v54 = vpop.xlane.xlu2 %531  ;;  %v472_v28 = vpop.xlane.xlu0 %471  ;;  %v503_v46 = vcvt.f32.s32 %v502_v57 }
 0x18f   : > { %v533_v59 = vcvt.f32.s32 %v532_v54  ;;  %v473_v48 = vcvt.f32.s32 %v472_v28 }
 0x190   : > { %v506_v60 = vadd.s32 %v505_v37, %v503_v46 }
 0x191   : > { %v536_v45 = vadd.s32 %v535_v9, %v533_v59  ;;  %v476_v61 = vadd.s32 %v475_v58, %v473_v48  ;;  %v839_v9 = vld [vmem:[%s1371_s22] sm:$0xff] }
 0x192   : > { %vm556_vm1 = vcmp.eq.s32.totalorder %v506_v60, %v225_v53 }
 0x193   : > { %vm558_vm12 = vcmp.eq.s32.totalorder %v536_v45, %v227_v0  ;;  %v961_v51 = vsel %vm556_vm1, 1.0, %v1262_v52  ;;  %vm554_vm15 = vcmp.eq.s32.totalorder %v476_v61, %v223_v7 }
 0x194   : > { %v963_v27 = vsel %vm558_vm12, 1.0, %v1262_v52  ;;  %v1115_v6 = vpack.i.bf16 %v961_v51, %v962_v41  ;;  %v959_v31 = vsel %vm554_vm15, 1.0, %v1262_v52  ;;  %vm768_vm12 = vcmask 523264  }
 0x195   : > { %v1109_v5 = vpack.i.bf16 %v963_v27, %v964_v4  ;;  %v457_v14 = vpop.xlane.xlu1 %456  ;;  %994 = vmatmul.msk.f32.vlgmr.msra.gmra.mxu0 %vm768_vm12, %v984_v42  ;;  %1003 = vmatmul.msk.f32.vlgmr.msra.gmra.mxu1 %vm768_vm12, %v983_v39 }
 0x196   : > { %v487_v2 = vpop.xlane.xlu2 %486  ;;  %1116 = vperm.xlu0 %1114, %v1115_v6   ;;  %v458_v22 = vcvt.f32.s32 %v457_v14 }
 0x197   : > { %v488_v16 = vcvt.f32.s32 %v487_v2  ;;  %1110 = vperm.xlu2 %1108, %v1109_v5  }
 0x198   : > { %v461_v3 = vadd.s32 %v460_v26, %v458_v22 }
 0x199   : > { %v491_v21 = vadd.s32 %v490_v13, %v488_v16 }
 0x19a   : > { %vm553_vm6 = vcmp.eq.s32.totalorder %v461_v3, %v222_v12 }
 0x19b   : > { %vm555_vm13 = vcmp.eq.s32.totalorder %v491_v21, %v224_v20  ;;  %v958_v63 = vsel %vm553_vm6, 1.0, %v1262_v52 }
 0x19c   : > { %v960_v33 = vsel %vm555_vm13, 1.0, %v1262_v52 }
 0x19d   : > { %v1121_v55 = vpack.i.bf16 %v959_v31, %v960_v33 }
 0x19e   : > { %v442_v34 = vpop.xlane.xlu0 %441 }
 0x19f   : > { %v443_v11 = vcvt.f32.s32 %v442_v34  ;;  %1122 = vperm.xlu1 %1120, %v1121_v55  }
 0x1a1   : > { %v446_v24 = vadd.s32 %v445_v40, %v443_v11 }
 0x1a3   : > { %vm552_vm7 = vcmp.eq.s32.totalorder %v446_v24, %v221_v23 }
 0x1a4   : > { %v957_v25 = vsel %vm552_vm7, 1.0, %v1262_v52 }
 0x1a5   : > { %v1126_v44 = vpack.i.bf16 %v957_v25, %v958_v63 }
 0x1a7   : > { %1127 = vperm.xlu2 %1108, %v1126_v44  }
 0x1f1   : > { %v1111_v36 = vpop.permute.xlu2 %1110 }
 0x1f2   : > { %v1112_v29 = vunpack.i.l.bf16 %v1111_v36  ;;  %v1113_v15 = vunpack.i.h.bf16 %v1111_v36 }
 0x1f4   : > { %1004 = vmatpush.msk.msra.mxu2 %vm686_vm3, %v1112_v29  ;;  %vm765_vm3 = vcmp.eq.s32.totalorder %v1538_v56, 2 }
 0x1f5   : > { %v985_v50 = vsel %vm765_vm3, 1.0, %v1262_v52 }
 0x1f6   : > { %1005 = vmatpush.msk.msra.mxu2 %vm685_vm2, %v1113_v15 }
 0x201   : > { %v1128_v54 = vpop.permute.xlu2 %1127 }
 0x202   : > { %v1129_v37 = vunpack.i.l.bf16 %v1128_v54  ;;  %v1130_v30 = vunpack.i.h.bf16 %v1128_v54 }
 0x208   : > { %v1117_v38 = vpop.permute.xlu0 %1116 }
 0x209   : > { %v1118_v19 = vunpack.i.l.bf16 %v1117_v38  ;;  %v1119_v43 = vunpack.i.h.bf16 %v1117_v38 }
 0x20b   : > { %1006 = vmatpush.msk.msra.mxu2 %vm684_vm4, %v1118_v19 }
 0x20d   : > { %1007 = vmatpush.msk.msra.mxu2 %vm683_vm11, %v1119_v43 }
 0x211   : > { %v1123_v10 = vpop.permute.xlu1 %1122 }
 0x212   : > { %v1124_v35 = vunpack.i.l.bf16 %v1123_v10  ;;  %v1125_v57 = vunpack.i.h.bf16 %v1123_v10  ;;  %v789_v56 = vpop.f32.mrf.mxu0  ;;  %v812_v49 = vpop.f32.mrf.mxu1 }
 0x213   : > { %v813_v62 = vadd.f32 %v812_v49, %v789_v56 }
 0x214   : > { %1008 = vmatpush.msk.msra.mxu2 %vm682_vm0, %v1124_v35 }
 0x216   : > { %1009 = vmatpush.msk.msra.mxu2 %vm681_vm5, %v1125_v57 }
 0x218   : > { %1010 = vmatpush.msk.msra.mxu2 %vm680_vm14, %v1129_v37 }
 0x21a   : > { %1011 = vmatpush.msk.msra.mxu2 %vm679_vm8, %v1130_v30 }
 0x21b   : > { %1012 = vmatmul.msk.f32.vlgmr.msra.gmra.mxu2 %vm768_vm12, %v985_v50 }
 0x29e   : > { %v835_v32 = vpop.f32.mrf.mxu2 }
 0x29f   : > { %v838_v59 = vadd.f32 %v835_v32, %v813_v62 }
 0x2a1   : > { %v840_v18 = vadd.f32 %v839_v9, %v838_v59 }
 0x2a3   : > { %841 = vst [vmem:[%s1371_s22] sm:$0xff] %v840_v18 }
 0x2a4   : > { %1190 = shalt.err (!%p1187_p7)
}
 0x2a5   : > { %1033 = dma.vmem_to_hbm [thread:$0]  (%p1335_p3), %s856_s7, 128, %s858_s8, %s843_s9  }
 0x2a6 PF: > { %p1039_p8 = scmp.ge.s32.totalorder %s1257_s21, 2  ;;  %s869_s30 = sand.u32 1, %s1229_s14  }
 0x2a7   : > { %s870_s22 = scalar_lea.sflag [#allocation5], %s869_s30 }
 0x2a8   : > { %p1036_p10 = pnand %p1039_p8, %p1345_p9 }
 0x2aa   : > { %p1037_p11 = pneg %p1036_p10 }
 0x2ac   : > { %1224 = dma.done.wait (%p1037_p11), %s870_s22, 128  }
 0x2ad   : > { %1226 = vsyncadd (%p1037_p11), %s870_s22, 4294967168  ;;  %s17_s21 = sadd.s32 1, %s1257_s21   ;;  %s1980_s14 = smov %s1233_s15 }
 0x2ae   : > { %p14_p12 = scmp.ge.s32.totalorder %s17_s21, 6   ;;  %s1981_s15 = smov %s1237_s16 }
 0x2af   : > { %s1982_s16 = smov %s1353_s29  ;;  %s1983_s17 = smov %s1249_s19 }
 0x2b0   : > { %s1984_s18 = smov %s1253_s20  ;;  %s1985_s19 = smov %s1988_s23 }
 0x2b1   : > { %s1986_s20 = smov %s1992_s24  ;;  %16 = sbr.rel (!%p14_p12) target bundleno = 7 (0x7), region = 70 }
 0x2b6   :  { %876 = vsyncpa [#allocation5], 1 }
 0x2b7   :  { %878 = vsyncpa [#allocation5 + $0x1], 1 }

</bundles_post_ra>
